<compile_context>
chip_gen: v6e
topology: v6e:2x2x1
jax: 0.10.0
libtpu: 0.0.40
codegen_flags: <defaults>
</compile_context>

<pallas_src>
import math

import jax
import jax.numpy as jnp
from jax import lax
from jax.experimental import pallas as pl
from jax.experimental.pallas import tpu as pltpu


def _brm_kernel(x_ref, m1_ref, b1_ref, m2_ref, b2_ref, o_ref):
    # x_ref : (N, H, WC)       whole batch, W*Cp on the lane axis (WC % 128 == 0)
    # m*_ref: (3*WC, WC)       stacked banded conv weights [kh=0; kh=1; kh=2]
    # b*_ref: (1, WC)          bias tiled along W
    # o_ref : (N, H, WC)
    N, H, WC = x_ref.shape
    R = N * H

    # Free relayout: last dim unchanged, H is a multiple of 8.
    x = x_ref[...].reshape(R, WC).astype(jnp.float32)        # (R, WC)

    # Per-image vertical boundary masks (computed once, reused by both convs).
    row = lax.broadcasted_iota(jnp.int32, (R, WC), 0)
    rh = row % H
    top_mask = rh == 0                                       # no h-1 neighbor
    bot_mask = rh == H - 1                                   # no h+1 neighbor

    def conv(a, m_ref, b_ref):
        # Vertical taps via sublane roll (XLU) + mask; horizontal taps and
        # W-direction zero padding are encoded in the stacked banded matrix.
        up = jnp.where(bot_mask, 0.0, pltpu.roll(a, shift=R - 1, axis=0))  # a[h+1]
        dn = jnp.where(top_mask, 0.0, pltpu.roll(a, shift=1, axis=0))      # a[h-1]
        x3 = jnp.concatenate([dn, a, up], axis=-1)           # (R, 3*WC), K=3*WC
        acc = jnp.dot(x3, m_ref[...], preferred_element_type=jnp.float32)
        return acc + b_ref[...]                              # (1, WC) broadcast

    y = jnp.maximum(conv(x, m1_ref, b1_ref), 0.0)            # relu(conv1(x))
    z = conv(y, m2_ref, b2_ref)                              # conv2(...)
    o_ref[...] = (x + z).reshape(N, H, WC).astype(o_ref.dtype)  # one dense store


def _band_matrices(w_oihw, W):
    """PyTorch OIHW (Cout, Cin, 3, 3) -> (3, W*Cin, W*Cout) banded matrices.

    M[kh][wi*Cin + ci, wo*Cout + co] = w[co, ci, kh, (wi - wo) + 1] if |wi-wo| <= 1
                                       else 0
    so (x_row_{h+kh-1} @ M[kh]) accumulates all three horizontal taps of the
    3x3 conv for vertical tap kh, with W-direction zero padding built in.
    """
    Cout, Cin, KH, _ = w_oihw.shape
    w = jnp.transpose(w_oihw, (2, 3, 1, 0))                  # (kh, kw, Cin, Cout)
    wi = jnp.arange(W)[:, None]
    wo = jnp.arange(W)[None, :]
    d = wi - wo                                              # (W, W)
    sel = jnp.abs(d) <= 1
    kw_idx = jnp.clip(d + 1, 0, 2)                           # (W, W)
    mats = []
    for kh in range(KH):
        blocks = w[kh][kw_idx]                               # (W, W, Cin, Cout)
        blocks = jnp.where(sel[:, :, None, None], blocks, 0.0)
        mats.append(jnp.transpose(blocks, (0, 2, 1, 3)).reshape(W * Cin, W * Cout))
    return jnp.stack(mats, axis=0)                           # (3, W*Cin, W*Cout)


def boundary_refine(x_nchw, w1, b1, w2, b2):
    """x_nchw: (N, C, H, W); w*: (C, C, 3, 3) (PyTorch OIHW); b*: (C,)."""
    N, C, H, W = x_nchw.shape

    # Pad channels so the lane axis W*Cp is a multiple of 128 (dense vregs,
    # unmasked stores, full MXU N-dim).  Zero-padded weights/bias keep the pad
    # channels identically zero, so they can't pollute real channels.
    step = 128 // math.gcd(W, 128)
    Cp = ((C + step - 1) // step) * step
    WC = W * Cp

    # NCHW -> NHWC -> pad C -> lane-dense (N, H, W*Cp)
    x_nhwc = jnp.transpose(x_nchw, (0, 2, 3, 1))
    x_nhwc = jnp.pad(x_nhwc, ((0, 0), (0, 0), (0, 0), (0, Cp - C)))
    x_flat = x_nhwc.reshape(N, H, WC)

    def pad_params(w, b):
        wp = jnp.pad(w, ((0, Cp - C), (0, Cp - C), (0, 0), (0, 0)))
        bp = jnp.pad(b, ((0, Cp - C),))
        return wp, bp

    w1p, b1p = pad_params(w1, b1)
    w2p, b2p = pad_params(w2, b2)

    # Stack the three vertical-tap banded matrices into one (3*WC, WC) operand
    # so each conv is a single K=3*WC matmul.
    m1 = _band_matrices(w1p, W).reshape(3 * WC, WC)
    m2 = _band_matrices(w2p, W).reshape(3 * WC, WC)
    b1t = jnp.tile(b1p, W).reshape(1, WC)                    # b1t[w*Cp + c] = b1[c]
    b2t = jnp.tile(b2p, W).reshape(1, WC)

    out_flat = pl.pallas_call(
        _brm_kernel,
        out_shape=jax.ShapeDtypeStruct((N, H, WC), x_flat.dtype),
        grid_spec=pltpu.PrefetchScalarGridSpec(
            num_scalar_prefetch=0,
            grid=(1,),                                       # whole batch per step
            in_specs=[
                pl.BlockSpec((N, H, WC), lambda i: (0, 0, 0)),
                pl.BlockSpec((3 * WC, WC), lambda i: (0, 0)),
                pl.BlockSpec((1, WC), lambda i: (0, 0)),
                pl.BlockSpec((3 * WC, WC), lambda i: (0, 0)),
                pl.BlockSpec((1, WC), lambda i: (0, 0)),
            ],
            out_specs=pl.BlockSpec((N, H, WC), lambda i: (0, 0, 0)),
        ),
        compiler_params=pltpu.CompilerParams(
            dimension_semantics=("arbitrary",),
            vmem_limit_bytes=32 * 1024 * 1024),
    )(x_flat, m1, b1t, m2, b2t)

    # (N, H, W*Cp) -> strip channel padding -> NCHW
    out = out_flat.reshape(N, H, W, Cp)[..., :C]
    return jnp.transpose(out, (0, 3, 1, 2))


def _reference(x_nchw, w1, b1, w2, b2):
    """Pure-JAX reference matching the PyTorch forward."""
    dn = ('NCHW', 'OIHW', 'NCHW')
    r = lax.conv_general_dilated(x_nchw, w1, (1, 1), ((1, 1), (1, 1)),
                                 dimension_numbers=dn) + b1[None, :, None, None]
    r = jnp.maximum(r, 0.0)
    r = lax.conv_general_dilated(r, w2, (1, 1), ((1, 1), (1, 1)),
                                 dimension_numbers=dn) + b2[None, :, None, None]
    return x_nchw + r


if __name__ == "__main__":
    N, C, H, W = 2, 4, 16, 16  # dim = 4

    key = jax.random.PRNGKey(0)
    kx, kw1, kb1, kw2, kb2 = jax.random.split(key, 5)

    x = jax.random.normal(kx, (N, C, H, W), dtype=jnp.float32)
    # Synthetic parameters with shapes per nn.Conv2d(dim, dim, 3, padding=1).
    w1 = jax.random.normal(kw1, (C, C, 3, 3), dtype=jnp.float32) * 0.1
    b1 = jax.random.normal(kb1, (C,), dtype=jnp.float32) * 0.1
    w2 = jax.random.normal(kw2, (C, C, 3, 3), dtype=jnp.float32) * 0.1
    b2 = jax.random.normal(kb2, (C,), dtype=jnp.float32) * 0.1

    out = boundary_refine(x, w1, b1, w2, b2)
    out = jax.block_until_ready(out)

    ref = _reference(x, w1, b1, w2, b2)
    assert out.shape == (N, C, H, W)
    # Banded-matmul reassociates the conv summation order -> keep tolerance.
    assert jnp.allclose(out, ref, atol=1e-4, rtol=1e-4), "mismatch vs reference"

    print("KERNEL_OK")
</pallas_src>

<mosaic_0001>
module attributes {stable_mosaic.version = 11 : i64} {
  func.func @_brm_kernel(%arg0: i32, %arg1: memref<2x16x128xf32, #tpu.memory_space<vmem>>, %arg2: memref<384x128xf32, #tpu.memory_space<vmem>>, %arg3: memref<1x128xf32, #tpu.memory_space<vmem>>, %arg4: memref<384x128xf32, #tpu.memory_space<vmem>>, %arg5: memref<1x128xf32, #tpu.memory_space<vmem>>, %arg6: memref<2x16x128xf32, #tpu.memory_space<vmem>>) attributes {dimension_semantics = [#tpu.dimension_semantics<arbitrary>], iteration_bounds = array<i64: 1>, scalar_prefetch = 0 : i64, scratch_operands = 0 : i64, tpu.core_type = #tpu.core_type<tc>, window_params = [{pipeline_mode = #tpu.pipeline_mode<synchronous>, transform_indices = @transform_0, window_bounds = array<i64: 2, 16, 128>}, {pipeline_mode = #tpu.pipeline_mode<synchronous>, transform_indices = @transform_1, window_bounds = array<i64: 384, 128>}, {pipeline_mode = #tpu.pipeline_mode<synchronous>, transform_indices = @transform_2, window_bounds = array<i64: 1, 128>}, {pipeline_mode = #tpu.pipeline_mode<synchronous>, transform_indices = @transform_3, window_bounds = array<i64: 384, 128>}, {pipeline_mode = #tpu.pipeline_mode<synchronous>, transform_indices = @transform_4, window_bounds = array<i64: 1, 128>}, {pipeline_mode = #tpu.pipeline_mode<synchronous>, transform_indices = @transform_5, window_bounds = array<i64: 2, 16, 128>}]} {
    %c0 = arith.constant 0 : index
    %c0_0 = arith.constant 0 : index
    %c0_1 = arith.constant 0 : index
    %0 = vector.load %arg1[%c0, %c0_0, %c0_1] : memref<2x16x128xf32, #tpu.memory_space<vmem>>, vector<2x16x128xf32>
    %1 = vector.shape_cast %0 : vector<2x16x128xf32> to vector<32x128xf32>
    %2 = tpu.iota {dimensions = array<i32: 0>} : vector<32x128xi32>
    %c16_i32 = arith.constant 16 : i32
    %c0_i32 = arith.constant 0 : i32
    %3 = arith.cmpi eq, %c16_i32, %c0_i32 : i32
    %c1_i32 = arith.constant 1 : i32
    %4 = arith.select %3, %c1_i32, %c16_i32 : i32
    %5 = vector.broadcast %4 : i32 to vector<32x128xi32>
    %6 = arith.remsi %2, %5 : vector<32x128xi32>
    %c0_i32_2 = arith.constant 0 : i32
    %7 = vector.broadcast %c0_i32_2 : i32 to vector<32x128xi32>
    %8 = arith.cmpi ne, %6, %7 : vector<32x128xi32>
    %c0_i32_3 = arith.constant 0 : i32
    %9 = vector.broadcast %c0_i32_3 : i32 to vector<32x128xi32>
    %10 = arith.cmpi slt, %6, %9 : vector<32x128xi32>
    %c0_i32_4 = arith.constant 0 : i32
    %11 = arith.cmpi slt, %4, %c0_i32_4 : i32
    %12 = vector.broadcast %11 : i1 to vector<32x128xi1>
    %13 = vector.broadcast %12 : vector<32x128xi1> to vector<32x128xi1>
    %14 = arith.xori %10, %13 : vector<32x128xi1>
    %15 = arith.andi %14, %8 : vector<32x128xi1>
    %16 = vector.broadcast %4 : i32 to vector<32x128xi32>
    %17 = arith.addi %6, %16 : vector<32x128xi32>
    %18 = arith.select %15, %17, %6 : vector<32x128xi1>, vector<32x128xi32>
    %c0_i32_5 = arith.constant 0 : i32
    %19 = vector.broadcast %c0_i32_5 : i32 to vector<32x128xi32>
    %20 = arith.cmpi eq, %18, %19 : vector<32x128xi32>
    %c15_i32 = arith.constant 15 : i32
    %21 = vector.broadcast %c15_i32 : i32 to vector<32x128xi32>
    %22 = arith.cmpi eq, %18, %21 : vector<32x128xi32>
    %c31_i32 = arith.constant 31 : i32
    %23 = tpu.dynamic_rotate %1 by %c31_i32 dim 0 : vector<32x128xf32>, i32 -> vector<32x128xf32>
    %cst = arith.constant 0.000000e+00 : f32
    %24 = vector.broadcast %cst : f32 to vector<32x128xf32>
    %25 = arith.select %22, %24, %23 : vector<32x128xi1>, vector<32x128xf32>
    %c1_i32_6 = arith.constant 1 : i32
    %26 = tpu.dynamic_rotate %1 by %c1_i32_6 dim 0 : vector<32x128xf32>, i32 -> vector<32x128xf32>
    %cst_7 = arith.constant 0.000000e+00 : f32
    %27 = vector.broadcast %cst_7 : f32 to vector<32x128xf32>
    %28 = arith.select %20, %27, %26 : vector<32x128xi1>, vector<32x128xf32>
    %29 = tpu.concatenate %28, %1, %25 in 1 : vector<32x128xf32>, vector<32x128xf32>, vector<32x128xf32> -> vector<32x384xf32>
    %c0_8 = arith.constant 0 : index
    %c0_9 = arith.constant 0 : index
    %30 = vector.load %arg2[%c0_8, %c0_9] : memref<384x128xf32, #tpu.memory_space<vmem>>, vector<384x128xf32>
    %cst_10 = arith.constant dense<0.000000e+00> : vector<32x128xf32>
    %31 = tpu.matmul %29, %30, %cst_10 {dimension_numbers = #tpu.dot_dimension_numbers<[1], [0], [0], [1], [0, 0, 1, 1], [], []>} : vector<32x384xf32>, vector<384x128xf32>, vector<32x128xf32> -> vector<32x128xf32>
    %c0_11 = arith.constant 0 : index
    %c0_12 = arith.constant 0 : index
    %32 = vector.load %arg3[%c0_11, %c0_12] : memref<1x128xf32, #tpu.memory_space<vmem>>, vector<1x128xf32>
    %33 = vector.broadcast %32 : vector<1x128xf32> to vector<32x128xf32>
    %34 = arith.addf %31, %33 : vector<32x128xf32>
    %cst_13 = arith.constant 0.000000e+00 : f32
    %35 = vector.broadcast %cst_13 : f32 to vector<32x128xf32>
    %36 = arith.maximumf %34, %35 : vector<32x128xf32>
    %c31_i32_14 = arith.constant 31 : i32
    %37 = tpu.dynamic_rotate %36 by %c31_i32_14 dim 0 : vector<32x128xf32>, i32 -> vector<32x128xf32>
    %cst_15 = arith.constant 0.000000e+00 : f32
    %38 = vector.broadcast %cst_15 : f32 to vector<32x128xf32>
    %39 = arith.select %22, %38, %37 : vector<32x128xi1>, vector<32x128xf32>
    %c1_i32_16 = arith.constant 1 : i32
    %40 = tpu.dynamic_rotate %36 by %c1_i32_16 dim 0 : vector<32x128xf32>, i32 -> vector<32x128xf32>
    %cst_17 = arith.constant 0.000000e+00 : f32
    %41 = vector.broadcast %cst_17 : f32 to vector<32x128xf32>
    %42 = arith.select %20, %41, %40 : vector<32x128xi1>, vector<32x128xf32>
    %43 = tpu.concatenate %42, %36, %39 in 1 : vector<32x128xf32>, vector<32x128xf32>, vector<32x128xf32> -> vector<32x384xf32>
    %c0_18 = arith.constant 0 : index
    %c0_19 = arith.constant 0 : index
    %44 = vector.load %arg4[%c0_18, %c0_19] : memref<384x128xf32, #tpu.memory_space<vmem>>, vector<384x128xf32>
    %cst_20 = arith.constant dense<0.000000e+00> : vector<32x128xf32>
    %45 = tpu.matmul %43, %44, %cst_20 {dimension_numbers = #tpu.dot_dimension_numbers<[1], [0], [0], [1], [0, 0, 1, 1], [], []>} : vector<32x384xf32>, vector<384x128xf32>, vector<32x128xf32> -> vector<32x128xf32>
    %c0_21 = arith.constant 0 : index
    %c0_22 = arith.constant 0 : index
    %46 = vector.load %arg5[%c0_21, %c0_22] : memref<1x128xf32, #tpu.memory_space<vmem>>, vector<1x128xf32>
    %47 = vector.broadcast %46 : vector<1x128xf32> to vector<32x128xf32>
    %48 = arith.addf %45, %47 : vector<32x128xf32>
    %49 = arith.addf %1, %48 : vector<32x128xf32>
    %50 = vector.shape_cast %49 : vector<32x128xf32> to vector<2x16x128xf32>
    %c0_23 = arith.constant 0 : index
    %c0_24 = arith.constant 0 : index
    %c0_25 = arith.constant 0 : index
    %51 = vector.load %arg6[%c0_23, %c0_24, %c0_25] : memref<2x16x128xf32, #tpu.memory_space<vmem>>, vector<2x16x128xf32>
    tpu.vector_store %arg6[%c0_23, %c0_24, %c0_25], %50 {strides = array<i32>} : memref<2x16x128xf32, #tpu.memory_space<vmem>>, vector<2x16x128xf32>,
    return
  }
  func.func @transform_0(%arg0: i32) -> (i32, i32, i32) {
    %c0_i32 = arith.constant 0 : i32
    %c0_i32_0 = arith.constant 0 : i32
    %c0_i32_1 = arith.constant 0 : i32
    %c0_i32_2 = arith.constant 0 : i32
    return %c0_i32, %c0_i32_0, %c0_i32_1 : i32, i32, i32
  }
  func.func @transform_1(%arg0: i32) -> (i32, i32) {
    %c0_i32 = arith.constant 0 : i32
    %c0_i32_0 = arith.constant 0 : i32
    %c0_i32_1 = arith.constant 0 : i32
    return %c0_i32, %c0_i32_0 : i32, i32
  }
  func.func @transform_2(%arg0: i32) -> (i32, i32) {
    %c0_i32 = arith.constant 0 : i32
    %c0_i32_0 = arith.constant 0 : i32
    %c0_i32_1 = arith.constant 0 : i32
    return %c0_i32, %c0_i32_0 : i32, i32
  }
  func.func @transform_3(%arg0: i32) -> (i32, i32) {
    %c0_i32 = arith.constant 0 : i32
    %c0_i32_0 = arith.constant 0 : i32
    %c0_i32_1 = arith.constant 0 : i32
    return %c0_i32, %c0_i32_0 : i32, i32
  }
  func.func @transform_4(%arg0: i32) -> (i32, i32) {
    %c0_i32 = arith.constant 0 : i32
    %c0_i32_0 = arith.constant 0 : i32
    %c0_i32_1 = arith.constant 0 : i32
    return %c0_i32, %c0_i32_0 : i32, i32
  }
  func.func @transform_5(%arg0: i32) -> (i32, i32, i32) {
    %c0_i32 = arith.constant 0 : i32
    %c0_i32_0 = arith.constant 0 : i32
    %c0_i32_1 = arith.constant 0 : i32
    %c0_i32_2 = arith.constant 0 : i32
    return %c0_i32, %c0_i32_0, %c0_i32_1 : i32, i32, i32
  }
}

</mosaic_0001>

<bundles_post_ra>
// kernel: tpu_custom_call.1
= control target key start
LH: loop header
LB: loop body
LE: loop exit
PB: predicated region body
PF: predicated region fallthrough
CT: control target
= control target key end

     0   :  { %10 = vsyncpa [#allocation3], 0  ;;  %s1141_s0 = inlined_call_operand.hbm [shape: f32[2,16,128], index: 0, kind: input, shape index: {}]   ;;  %s1142_s1 = inlined_call_operand.hbm [shape: f32[384,128], index: 1, kind: input, shape index: {}]   ;;  %s1143_s2 = inlined_call_operand.vmem [shape: f32[1,128], index: 2, kind: input, shape index: {}]   ;;  %s1144_s3 = inlined_call_operand.hbm [shape: f32[384,128], index: 3, kind: input, shape index: {}]   ;;  %s1145_s4 = inlined_call_operand.vmem [shape: f32[1,128], index: 4, kind: input, shape index: {}]   ;;  %s1146_s5 = inlined_call_operand.hbm [shape: f32[2,16,128], index: 5, kind: output, shape index: {}]  }
   0x1   :  { %11 = vsyncpa [#allocation6], 0 }
   0x2   :  { %12 = vsyncpa [#allocation4], 0  ;;  %s975_s18 = smov [#allocation5]   ;;  %s976_s20 = smov [#allocation2]  }
   0x3   :  { %s30_s19 = sshll.u32 %s975_s18, 4  ;;  %s18_s21 = sshll.u32 %s976_s20, 4  ;;  %s31_s19 = int_to_ptr.vmem [resolvable:$true] %s30_s19  ;;  %s19_s21 = int_to_ptr.vmem [resolvable:$true] %s18_s21 }
   0x4   :  { %s897_s22 = scalar_lea.vmem %s31_s19, 6144  ;;  %p902_p1 = scmp.lt.s32.totalorder %s31_s19, %s31_s19 }
   0x5   :  { %p898_p0 = scmp.ne.s32.totalorder %s31_s19, %s897_s22  ;;  %p903_p2 = scmp.lt.s32.totalorder %s897_s22, %s897_s22 }
   0x7   :  { %p904_p3 = por %p903_p2, %p902_p1 }
   0x9   :  { %p905_p4 = pnand %p904_p3, %p898_p0 }
   0xb   :  { %908 = shalt.err (!%p905_p4)
}
   0xc   :  { %s977_s23 = smov 128   ;;  %s978_s24 = smov 8  }
   0xd   :  { %36 = dma.hbm_to_vmem [thread:$0]  %s1142_s1, 6144, %s31_s19, [#allocation6], %s977_s23, %s977_s23, %s978_s24  }
   0xe   :  { %s917_s27 = scalar_lea.vmem %s19_s21, 512  ;;  %p922_p6 = scmp.lt.s32.totalorder %s19_s21, %s19_s21 }
   0xf   :  { %p918_p5 = scmp.ne.s32.totalorder %s19_s21, %s917_s27  ;;  %p923_p7 = scmp.lt.s32.totalorder %s917_s27, %s917_s27 }
  0x11   :  { %p924_p8 = por %p923_p7, %p922_p6 }
  0x13   :  { %p925_p9 = pnand %p924_p8, %p918_p5 }
  0x15   :  { %928 = shalt.err (!%p925_p9)
}
  0x16   :  { %24 = dma.hbm_to_vmem [thread:$0]  %s1141_s0, 512, %s19_s21, [#allocation3], %s977_s23, %s977_s23, %s978_s24  }
  0x17   :  { %s979_s30 = smov [#allocation7]  }
  0x18   :  { %s44_s6 = sshll.u32 %s979_s30, 4  ;;  %s45_s6 = int_to_ptr.vmem [resolvable:$true] %s44_s6 }
  0x19   :  { %s937_s7 = scalar_lea.vmem %s45_s6, 6144  ;;  %p942_p11 = scmp.lt.s32.totalorder %s45_s6, %s45_s6 }
  0x1a   :  { %p938_p10 = scmp.ne.s32.totalorder %s45_s6, %s937_s7  ;;  %p943_p12 = scmp.lt.s32.totalorder %s937_s7, %s937_s7 }
  0x1c   :  { %p944_p13 = por %p943_p12, %p942_p11 }
  0x1e   :  { %p945_p0 = pnand %p944_p13, %p938_p10 }
  0x20   :  { %948 = shalt.err (!%p945_p0)
}
  0x21   :  { %50 = dma.hbm_to_vmem [thread:$0]  %s1144_s3, 6144, %s45_s6, [#allocation6], %s977_s23, %s977_s23, %s978_s24  }
  0x22   :  { %969 = dma.done.wait [#allocation3], 512  }
  0x23   :  { %970 = vsyncadd [#allocation3], 4294966784 }
  0x24   :  { %971 = dma.done.wait [#allocation6], 12288  }
  0x25   :  { %972 = vsyncadd [#allocation6], 4294955008  ;;  %v184_v0 = vld [vmem:[#allocation5 + $0xf8] sm:$0xff]  ;;  %v183_v2 = vld [vmem:[#allocation5 + $0xf0] sm:$0xff]  ;;  %v66_v31 = vlaneseq }
  0x26   :  { %v168_v1 = vld [vmem:[#allocation5 + $0x78] sm:$0xff]  ;;  %679 = vmatprep.subr.mxu0 %v184_v0  ;;  %v167_v3 = vld [vmem:[#allocation5 + $0x70] sm:$0xff]  ;;  %v182_v5 = vld [vmem:[#allocation5 + $0xe8] sm:$0xff] }
  0x27   :  { %v200_v4 = vld [vmem:[#allocation5 + $0x178] sm:$0xff]  ;;  %680 = vmatpush3.msra.mxu0 %v168_v1  ;;  %v199_v6 = vld [vmem:[#allocation5 + $0x170] sm:$0xff]  ;;  %v166_v7 = vld [vmem:[#allocation5 + $0x68] sm:$0xff]  ;;  %v1029_v39 = vshrl.u32 %v66_v31, 7 }
  0x28   :  { %807 = vmatprep.subr.mxu1 %v200_v4  ;;  %681 = vmatprep.subr.mxu0 %v183_v2  ;;  %v198_v8 = vld [vmem:[#allocation5 + $0x168] sm:$0xff]  ;;  %v181_v9 = vld [vmem:[#allocation5 + $0xe0] sm:$0xff]  ;;  %v180_v12 = vld [vmem:[#allocation5 + $0xd8] sm:$0xff] }
  0x29   :  { %808 = vmatpush3.msra.mxu1 %v200_v4  ;;  %682 = vmatpush3.msra.mxu0 %v167_v3  ;;  %v165_v10 = vld [vmem:[#allocation5 + $0x60] sm:$0xff]  ;;  %v164_v13 = vld [vmem:[#allocation5 + $0x58] sm:$0xff]  ;;  %v179_v15 = vld [vmem:[#allocation5 + $0xd0] sm:$0xff]  ;;  %v68_v47 = vadd.s32 8, %v1029_v39  ;;  %v75_v50 = vand.u32 15, %v1029_v39  ;;  %vm144_vm0 = vcmp.lt.s32.totalorder %v1029_v39, 1 }
  0x2a   :  { %809 = vmatprep.subr.mxu1 %v199_v6  ;;  %683 = vmatprep.subr.mxu0 %v182_v5  ;;  %v197_v11 = vld [vmem:[#allocation5 + $0x160] sm:$0xff]  ;;  %v196_v14 = vld [vmem:[#allocation5 + $0x158] sm:$0xff]  ;;  %v163_v16 = vld [vmem:[#allocation5 + $0x50] sm:$0xff]  ;;  %vm131_vm1 = vcmp.lt.s32.totalorder %v1029_v39, 7  ;;  %v69_v61 = vadd.s32 16, %v1029_v39  ;;  %v70_v62 = vadd.s32 24, %v1029_v39 }
  0x2b   :  { %810 = vmatpush3.msra.mxu1 %v199_v6  ;;  %684 = vmatpush3.msra.mxu0 %v166_v7  ;;  %v195_v17 = vld [vmem:[#allocation5 + $0x150] sm:$0xff]  ;;  %v178_v18 = vld [vmem:[#allocation5 + $0xc8] sm:$0xff]  ;;  %v177_v21 = vld [vmem:[#allocation5 + $0xc0] sm:$0xff]  ;;  %v82_v59 = vand.u32 15, %v68_v47  ;;  %vm1055_vm2 = vcmp.ne.s32.totalorder %v75_v50, 0 }
  0x2c   :  { %811 = vmatprep.subr.mxu1 %v198_v8  ;;  %685 = vmatprep.subr.mxu0 %v181_v9  ;;  %v162_v19 = vld [vmem:[#allocation5 + $0x48] sm:$0xff]  ;;  %v161_v22 = vld [vmem:[#allocation5 + $0x40] sm:$0xff]  ;;  %v176_v24 = vld [vmem:[#allocation5 + $0xb8] sm:$0xff] }
  0x2d   :  { %812 = vmatpush3.msra.mxu1 %v198_v8  ;;  %686 = vmatpush3.msra.mxu0 %v165_v10  ;;  %v194_v20 = vld [vmem:[#allocation5 + $0x148] sm:$0xff]  ;;  %v193_v23 = vld [vmem:[#allocation5 + $0x140] sm:$0xff]  ;;  %v160_v25 = vld [vmem:[#allocation5 + $0x38] sm:$0xff]  ;;  %vm1067_vm3 = vcmp.ne.s32.totalorder %v82_v59, 15  ;;  %v96_v8 = vand.u32 15, %v70_v62 }
  0x2e   :  { %813 = vmatprep.subr.mxu1 %v197_v11  ;;  %687 = vmatprep.subr.mxu0 %v180_v12  ;;  %v192_v26 = vld [vmem:[#allocation5 + $0x138] sm:$0xff]  ;;  %v175_v27 = vld [vmem:[#allocation5 + $0xb0] sm:$0xff]  ;;  %v174_v30 = vld [vmem:[#allocation5 + $0xa8] sm:$0xff] }
  0x2f   :  { %814 = vmatpush3.msra.mxu1 %v197_v11  ;;  %688 = vmatpush3.msra.mxu0 %v164_v13  ;;  %v159_v28 = vld [vmem:[#allocation5 + $0x30] sm:$0xff]  ;;  %v158_v32 = vld [vmem:[#allocation5 + $0x28] sm:$0xff]  ;;  %v173_v34 = vld [vmem:[#allocation5 + $0xa0] sm:$0xff]  ;;  %v89_v11 = vand.u32 15, %v69_v61  ;;  %vm1081_vm4 = vcmp.ne.s32.totalorder %v96_v8, 15 }
  0x30   :  { %815 = vmatprep.subr.mxu1 %v196_v14  ;;  %689 = vmatprep.subr.mxu0 %v179_v15  ;;  %v191_v29 = vld [vmem:[#allocation5 + $0x130] sm:$0xff]  ;;  %v190_v33 = vld [vmem:[#allocation5 + $0x128] sm:$0xff]  ;;  %v157_v35 = vld [vmem:[#allocation5 + $0x20] sm:$0xff] }
  0x31   :  { %816 = vmatpush3.msra.mxu1 %v196_v14  ;;  %690 = vmatpush3.msra.mxu0 %v163_v16  ;;  %v189_v36 = vld [vmem:[#allocation5 + $0x120] sm:$0xff]  ;;  %v172_v37 = vld [vmem:[#allocation5 + $0x98] sm:$0xff]  ;;  %v171_v43 = vld [vmem:[#allocation5 + $0x90] sm:$0xff]  ;;  %vm1088_vm5 = vcmp.ne.s32.totalorder %v89_v11, 0 }
  0x32   :  { %817 = vmatprep.subr.mxu1 %v195_v17  ;;  %691 = vmatprep.subr.mxu0 %v178_v18  ;;  %v156_v38 = vld [vmem:[#allocation5 + $0x18] sm:$0xff]  ;;  %v1031_v41 = vld [vmem:[#allocation2] sm:$0xff]  ;;  %v155_v44 = vld [vmem:[#allocation5 + $0x10] sm:$0xff] }
  0x33   :  { %818 = vmatpush3.msra.mxu1 %v195_v17  ;;  %692 = vmatpush3.msra.mxu0 %v162_v19  ;;  %v188_v40 = vld [vmem:[#allocation5 + $0x118] sm:$0xff]  ;;  %v187_v45 = vld [vmem:[#allocation5 + $0x110] sm:$0xff]  ;;  %v1035_v46 = vld [vmem:[#allocation2 + $0x8] sm:$0xff]  ;;  %v140_v49 = vrot.slane %v1031_v41, 7  ;;  %v127_v56 = vrot.slane %v1031_v41, 1 }
  0x34   :  { %819 = vmatprep.subr.mxu1 %v194_v20  ;;  %693 = vmatprep.subr.mxu0 %v177_v21  ;;  %v1033_v42 = vld [vmem:[#allocation2 + $0x18] sm:$0xff]  ;;  %v170_v48 = vld [vmem:[#allocation5 + $0x88] sm:$0xff]  ;;  %v1041_v52 = vld [vmem:[#allocation2 + $0x10] sm:$0xff]  ;;  %v128_v57 = vrot.slane %v1035_v46, 1  ;;  %v141_v2 = vrot.slane %v1035_v46, 7 }
  0x35   :  { %820 = vmatpush3.msra.mxu1 %v194_v20  ;;  %694 = vmatpush3.msra.mxu0 %v161_v22  ;;  %v143_v51 = vrot.slane %v1033_v42, 7  ;;  %v154_v53 = vld [vmem:[#allocation5 + $0x8] sm:$0xff]  ;;  %v169_v54 = vld [vmem:[#allocation5 + $0x80] sm:$0xff]  ;;  %v129_v60 = vrot.slane %v1041_v52, 1  ;;  %v130_v3 = vrot.slane %v1033_v42, 1  ;;  %v453_v5 = vld [vmem:[#allocation7 + $0x178] sm:$0xff] }
  0x36   :  { %821 = vmatprep.subr.mxu1 %v193_v23  ;;  %695 = vmatprep.subr.mxu0 %v176_v24  ;;  %v186_v55 = vld [vmem:[#allocation5 + $0x108] sm:$0xff]  ;;  %v153_v58 = vld [vmem:[#allocation5] sm:$0xff]  ;;  %v134_v4 = vsel %vm131_vm1, %v127_v56, %v128_v57  ;;  %v437_v9 = vld [vmem:[#allocation7 + $0xf8] sm:$0xff]  ;;  %v147_v10 = vsel %vm144_vm0, %v140_v49, %v141_v2  ;;  %v142_v12 = vrot.slane %v1041_v52, 7 }
  0x37   :  { %822 = vmatpush3.msra.mxu1 %v193_v23  ;;  %696 = vmatpush3.msra.mxu0 %v160_v25  ;;  %v148_v63 = vsel %vm144_vm0, %v143_v51, %v140_v49  ;;  %v185_v1 = vld [vmem:[#allocation5 + $0x100] sm:$0xff]  ;;  %v133_v6 = vsel %vm131_vm1, %v128_v57, %v129_v60  ;;  %v132_v13 = vsel %vm131_vm1, %v129_v60, %v130_v3  ;;  %v452_v14 = vld [vmem:[#allocation7 + $0x170] sm:$0xff]  ;;  %v421_v15 = vld [vmem:[#allocation7 + $0x78] sm:$0xff] }
  0x38   :  { %823 = vmatprep.subr.mxu1 %v192_v26  ;;  %697 = vmatprep.subr.mxu0 %v175_v27  ;;  %v135_v16 = vsel %vm131_vm1, %v130_v3, %v127_v56  ;;  %v436_v18 = vld [vmem:[#allocation7 + $0xf0] sm:$0xff]  ;;  %v146_v19 = vsel %vm144_vm0, %v141_v2, %v142_v12  ;;  %v451_v21 = vld [vmem:[#allocation7 + $0x168] sm:$0xff]  ;;  %v450_v23 = vld [vmem:[#allocation7 + $0x160] sm:$0xff]  ;;  %v145_v25 = vsel %vm144_vm0, %v142_v12, %v143_v51 }
  0x39   :  { %824 = vmatpush3.msra.mxu1 %v192_v26  ;;  %698 = vmatpush3.msra.mxu0 %v159_v28  ;;  %v420_v22 = vld [vmem:[#allocation7 + $0x70] sm:$0xff]  ;;  %v435_v24 = vld [vmem:[#allocation7 + $0xe8] sm:$0xff]  ;;  %v449_v26 = vld [vmem:[#allocation7 + $0x158] sm:$0xff] }
  0x3a   :  { %825 = vmatprep.subr.mxu1 %v191_v29  ;;  %699 = vmatprep.subr.mxu0 %v174_v30  ;;  %v419_v27 = vld [vmem:[#allocation7 + $0x68] sm:$0xff]  ;;  %v434_v28 = vld [vmem:[#allocation7 + $0xe0] sm:$0xff]  ;;  %v433_v31 = vld [vmem:[#allocation7 + $0xd8] sm:$0xff] }
  0x3b   :  { %826 = vmatpush3.msra.mxu1 %v191_v29  ;;  %700 = vmatpush3.msra.mxu0 %v158_v32  ;;  %v448_v29 = vld [vmem:[#allocation7 + $0x150] sm:$0xff]  ;;  %v418_v30 = vld [vmem:[#allocation7 + $0x60] sm:$0xff]  ;;  %v447_v32 = vld [vmem:[#allocation7 + $0x148] sm:$0xff] }
  0x3c   :  { %827 = vmatprep.subr.mxu1 %v190_v33  ;;  %701 = vmatprep.subr.mxu0 %v173_v34  ;;  %v432_v34 = vld [vmem:[#allocation7 + $0xd0] sm:$0xff]  ;;  %v429_v47 = vld [vmem:[#allocation7 + $0xb8] sm:$0xff]  ;;  %v442_v51 = vld [vmem:[#allocation7 + $0x120] sm:$0xff] }
  0x3d   :  { %828 = vmatpush3.msra.mxu1 %v190_v33  ;;  %702 = vmatpush3.msra.mxu0 %v157_v35  ;;  %v417_v33 = vld [vmem:[#allocation7 + $0x58] sm:$0xff]  ;;  %v446_v35 = vld [vmem:[#allocation7 + $0x140] sm:$0xff]  ;;  %v428_v50 = vld [vmem:[#allocation7 + $0xb0] sm:$0xff] }
  0x3e   :  { %829 = vmatprep.subr.mxu1 %v189_v36  ;;  %703 = vmatprep.subr.mxu0 %v172_v37  ;;  %v431_v37 = vld [vmem:[#allocation7 + $0xc8] sm:$0xff]  ;;  %v413_v49 = vld [vmem:[#allocation7 + $0x38] sm:$0xff]  ;;  %v426_v57 = vld [vmem:[#allocation7 + $0xa0] sm:$0xff] }
  0x3f   :  { %830 = vmatpush3.msra.mxu1 %v189_v36  ;;  %704 = vmatpush3.msra.mxu0 %v156_v38  ;;  %v416_v36 = vld [vmem:[#allocation7 + $0x50] sm:$0xff]  ;;  %v445_v38 = vld [vmem:[#allocation7 + $0x138] sm:$0xff]  ;;  %v411_v56 = vld [vmem:[#allocation7 + $0x28] sm:$0xff] }
  0x40   :  { %831 = vmatprep.subr.mxu1 %v188_v40  ;;  %705 = vmatprep.subr.mxu0 %v171_v43  ;;  %v430_v43 = vld [vmem:[#allocation7 + $0xc0] sm:$0xff]  ;;  %v425_v60 = vld [vmem:[#allocation7 + $0x98] sm:$0xff]  ;;  %v439_v61 = vld [vmem:[#allocation7 + $0x108] sm:$0xff] }
  0x41   :  { %832 = vmatpush3.msra.mxu1 %v188_v40  ;;  %706 = vmatpush3.msra.mxu0 %v155_v44  ;;  %v415_v40 = vld [vmem:[#allocation7 + $0x48] sm:$0xff]  ;;  %v444_v44 = vld [vmem:[#allocation7 + $0x130] sm:$0xff]  ;;  %v410_v59 = vld [vmem:[#allocation7 + $0x20] sm:$0xff] }
  0x42   :  { %833 = vmatprep.subr.mxu1 %v187_v45  ;;  %707 = vmatprep.subr.mxu0 %v170_v48  ;;  %v443_v48 = vld [vmem:[#allocation7 + $0x128] sm:$0xff]  ;;  %v409_v62 = vld [vmem:[#allocation7 + $0x18] sm:$0xff]  ;;  %v408_v2 = vld [vmem:[#allocation7 + $0x10] sm:$0xff] }
  0x43   :  { %272 = vmatprep.mubr.f32.mxu0 %v1031_v41  ;;  %708 = vmatpush3.msra.mxu0 %v154_v53  ;;  %v412_v53 = vld [vmem:[#allocation7 + $0x30] sm:$0xff]  ;;  %v423_v3 = vld [vmem:[#allocation7 + $0x88] sm:$0xff] }
  0x44   :  { %834 = vmatpush3.msra.mxu1 %v187_v45  ;;  %709 = vmatprep.subr.mxu0 %v169_v54  ;;  %v414_v45 = vld [vmem:[#allocation7 + $0x40] sm:$0xff]  ;;  %v427_v54 = vld [vmem:[#allocation7 + $0xa8] sm:$0xff] }
  0x45   :  { %835 = vmatprep.subr.mxu1 %v186_v55  ;;  %710 = vmatpush3.msra.mxu0 %v153_v58  ;;  %v440_v58 = vld [vmem:[#allocation7 + $0x110] sm:$0xff] }
  0x46   :  { %836 = vmatpush3.msra.mxu1 %v186_v55  ;;  %659 = vmatmul.mubr.msk.f32.vlgmr.msra.gmra.mxu0 %vm1055_vm2, %v148_v63  ;;  %v441_v55 = vld [vmem:[#allocation7 + $0x118] sm:$0xff]  ;;  %v424_v63 = vld [vmem:[#allocation7 + $0x90] sm:$0xff] }
  0x47   :  { %837 = vmatprep.subr.mxu1 %v185_v1  ;;  %277 = vmatprep.mubr.f32.mxu0 %v1035_v46 }
  0x48   :  { %838 = vmatpush3.msra.mxu1 %v185_v1  ;;  %839 = vmatprep.mubr.f32.mxu1 %v134_v4  ;;  %v438_v1 = vld [vmem:[#allocation7 + $0x100] sm:$0xff]  ;;  %v407_v4 = vld [vmem:[#allocation7 + $0x8] sm:$0xff] }
  0x49   :  { %845 = vmatprep.subr.mxu1 %v453_v5  ;;  %840 = vmatmul.mubr.msk.f32.vlgmr.msra.gmra.mxu1 %vm1067_vm3, %v133_v6  ;;  %v406_v6 = vld [vmem:[#allocation7] sm:$0xff] }
  0x4a   :  { %743 = vmatprep.subr.mxu0 %v437_v9  ;;  %278 = vmatmul.mubr.f32.gmra.mxu0 %v147_v10  ;;  %v657_v10 = vld [vmem:[%s1143_s2] ss:$0 sm:$0xff] }
  0x4b   :  { %842 = vmatprep.mubr.f32.mxu1 %v132_v13  ;;  %282 = vmatprep.mubr.f32.mxu0 %v1041_v52 }
  0x4c   :  { %846 = vmatpush3.msra.mxu1 %v453_v5  ;;  %744 = vmatpush3.msra.mxu0 %v421_v15  ;;  %v422_v5 = vld [vmem:[#allocation7 + $0x80] sm:$0xff] }
  0x4d   :  { %847 = vmatprep.subr.mxu1 %v452_v14  ;;  %843 = vmatmul.mubr.msk.f32.gmra.mxu1 %vm1081_vm4, %v135_v16 }
  0x4e   :  { %745 = vmatprep.subr.mxu0 %v436_v18  ;;  %661 = vmatmul.mubr.msk.f32.gmra.mxu0 %vm1088_vm5, %v146_v19 }
  0x4f   :  { %848 = vmatpush3.msra.mxu1 %v452_v14  ;;  %287 = vmatprep.mubr.f32.mxu0 %v1033_v42 }
  0x50   :  { %849 = vmatprep.subr.mxu1 %v451_v21  ;;  %746 = vmatpush3.msra.mxu0 %v420_v22 }
  0x51   :  { %850 = vmatpush3.msra.mxu1 %v451_v21  ;;  %747 = vmatprep.subr.mxu0 %v435_v24 }
  0x52   :  { %851 = vmatprep.subr.mxu1 %v450_v23  ;;  %288 = vmatmul.mubr.f32.gmra.mxu0 %v145_v25 }
  0x53   :  { %852 = vmatpush3.msra.mxu1 %v450_v23  ;;  %748 = vmatpush3.msra.mxu0 %v419_v27 }
  0x54   :  { %853 = vmatprep.subr.mxu1 %v449_v26  ;;  %749 = vmatprep.subr.mxu0 %v434_v28 }
  0x55   :  { %854 = vmatpush3.msra.mxu1 %v449_v26  ;;  %750 = vmatpush3.msra.mxu0 %v418_v30 }
  0x56   :  { %855 = vmatprep.subr.mxu1 %v448_v29  ;;  %751 = vmatprep.subr.mxu0 %v433_v31 }
  0x57   :  { %856 = vmatpush3.msra.mxu1 %v448_v29  ;;  %752 = vmatpush3.msra.mxu0 %v417_v33 }
  0x58   :  { %857 = vmatprep.subr.mxu1 %v447_v32  ;;  %753 = vmatprep.subr.mxu0 %v432_v34 }
  0x59   :  { %858 = vmatpush3.msra.mxu1 %v447_v32  ;;  %754 = vmatpush3.msra.mxu0 %v416_v36 }
  0x5a   :  { %859 = vmatprep.subr.mxu1 %v446_v35  ;;  %755 = vmatprep.subr.mxu0 %v431_v37 }
  0x5b   :  { %860 = vmatpush3.msra.mxu1 %v446_v35  ;;  %756 = vmatpush3.msra.mxu0 %v415_v40 }
  0x5c   :  { %861 = vmatprep.subr.mxu1 %v445_v38  ;;  %757 = vmatprep.subr.mxu0 %v430_v43 }
  0x5d   :  { %862 = vmatpush3.msra.mxu1 %v445_v38  ;;  %758 = vmatpush3.msra.mxu0 %v414_v45 }
  0x5e   :  { %863 = vmatprep.subr.mxu1 %v444_v44  ;;  %759 = vmatprep.subr.mxu0 %v429_v47 }
  0x5f   :  { %864 = vmatpush3.msra.mxu1 %v444_v44  ;;  %760 = vmatpush3.msra.mxu0 %v413_v49 }
  0x60   :  { %865 = vmatprep.subr.mxu1 %v443_v48  ;;  %761 = vmatprep.subr.mxu0 %v428_v50 }
  0x61   :  { %866 = vmatpush3.msra.mxu1 %v443_v48  ;;  %762 = vmatpush3.msra.mxu0 %v412_v53 }
  0x62   :  { %867 = vmatprep.subr.mxu1 %v442_v51  ;;  %763 = vmatprep.subr.mxu0 %v427_v54 }
  0x63   :  { %868 = vmatpush3.msra.mxu1 %v442_v51  ;;  %764 = vmatpush3.msra.mxu0 %v411_v56 }
  0x64   :  { %869 = vmatprep.subr.mxu1 %v441_v55  ;;  %765 = vmatprep.subr.mxu0 %v426_v57 }
  0x65   :  { %870 = vmatpush3.msra.mxu1 %v441_v55  ;;  %766 = vmatpush3.msra.mxu0 %v410_v59  ;;  %v666_v59 = vld [vmem:[%s1145_s4] ss:$0 sm:$0xff]  ;;  %s980_s4 = smov [#allocation8]  }
  0x66   :  { %871 = vmatprep.subr.mxu1 %v440_v58  ;;  %767 = vmatprep.subr.mxu0 %v425_v60  ;;  %s644_s10 = sshll.u32 %s980_s4, 4  ;;  %s645_s10 = int_to_ptr.vmem [resolvable:$true] %s644_s10 }
  0x67   :  { %872 = vmatpush3.msra.mxu1 %v440_v58  ;;  %768 = vmatpush3.msra.mxu0 %v409_v62  ;;  %s949_s11 = scalar_lea.vmem %s645_s10, 512  ;;  %p954_p2 = scmp.lt.s32.totalorder %s645_s10, %s645_s10 }
  0x68   :  { %873 = vmatprep.subr.mxu1 %v439_v61  ;;  %769 = vmatprep.subr.mxu0 %v424_v63  ;;  %p950_p1 = scmp.ne.s32.totalorder %s645_s10, %s949_s11  ;;  %p955_p3 = scmp.lt.s32.totalorder %s949_s11, %s949_s11 }
  0x69   :  { %874 = vmatpush3.msra.mxu1 %v439_v61  ;;  %770 = vmatpush3.msra.mxu0 %v408_v2 }
  0x6a   :  { %875 = vmatprep.subr.mxu1 %v438_v1  ;;  %771 = vmatprep.subr.mxu0 %v423_v3  ;;  %p956_p4 = por %p955_p3, %p954_p2 }
  0x6b   :  { %876 = vmatpush3.msra.mxu1 %v438_v1  ;;  %772 = vmatpush3.msra.mxu0 %v407_v4 }
  0x6c   :  { %773 = vmatprep.subr.mxu0 %v422_v5  ;;  %p957_p5 = pnand %p956_p4, %p950_p1 }
  0x6d   :  { %774 = vmatpush3.msra.mxu0 %v406_v6 }
 0x106   :  { %v711_v8 = vpop.f32.mrf.mxu0 }
 0x108   :  { %v712_v9 = vpop.f32.mrf.mxu0 }
 0x109   :  { %v713_v11 = vadd.f32 %v712_v9, %v711_v8  ;;  %v841_v12 = vpop.f32.mrf.mxu1 }
 0x10a   :  { %v714_v13 = vpop.f32.mrf.mxu0 }
 0x10b   :  { %v275_v14 = vadd.f32 %v713_v11, %v657_v10  ;;  %v359_v15 = vpop.f32.mrf.mxu1 }
 0x10c   :  { %v715_v16 = vpop.f32.mrf.mxu0 }
 0x10d   :  { %v716_v18 = vadd.f32 %v715_v16, %v714_v13  ;;  %v360_v19 = vadd.f32 %v359_v15, %v275_v14  ;;  %v844_v22 = vpop.f32.mrf.mxu1 }
 0x10e   :  { %v717_v21 = vpop.f32.mrf.mxu0 }
 0x10f   :  { %v280_v23 = vadd.f32 %v716_v18, %v657_v10  ;;  %v378_v24 = vmax.f32 %v360_v19, 0.0  ;;  %v369_v29 = vpop.f32.mrf.mxu1 }
 0x110   :  { %v718_v25 = vpop.f32.mrf.mxu0 }
 0x111   :  { %v365_v26 = vadd.f32 %v841_v12, %v280_v23  ;;  %v719_v27 = vadd.f32 %v718_v25, %v717_v21  ;;  %525 = vmatprep.mubr.f32.mxu0 %v378_v24  ;;  %v382_v33 = vrot.slane %v378_v24, 1  ;;  %v394_v48 = vrot.slane %v378_v24, 7 }
 0x112   :  { %v720_v28 = vpop.f32.mrf.mxu0 }
 0x113   :  { %v379_v30 = vmax.f32 %v365_v26, 0.0  ;;  %v285_v31 = vadd.f32 %v719_v27, %v657_v10 }
 0x114   :  { %v721_v32 = vpop.f32.mrf.mxu0 }
 0x115   :  { %v722_v34 = vadd.f32 %v721_v32, %v720_v28  ;;  %v370_v35 = vadd.f32 %v369_v29, %v285_v31  ;;  %v383_v36 = vrot.slane %v379_v30, 1  ;;  %v395_v55 = vrot.slane %v379_v30, 7 }
 0x117   :  { %v290_v37 = vadd.f32 %v722_v34, %v657_v10  ;;  %v380_v38 = vmax.f32 %v370_v35, 0.0  ;;  %v388_v40 = vsel %vm131_vm1, %v382_v33, %v383_v36  ;;  %v400_v56 = vsel %vm144_vm0, %v394_v48, %v395_v55 }
 0x118   :  { %877 = vmatprep.mubr.f32.mxu1 %v388_v40 }
 0x119   :  { %v375_v43 = vadd.f32 %v844_v22, %v290_v37  ;;  %v384_v44 = vrot.slane %v380_v38, 1  ;;  %v396_v7 = vrot.slane %v380_v38, 7 }
 0x11b   :  { %v381_v45 = vmax.f32 %v375_v43, 0.0  ;;  %v387_v47 = vsel %vm131_vm1, %v383_v36, %v384_v44  ;;  %v399_v57 = vsel %vm144_vm0, %v395_v55, %v396_v7 }
 0x11c   :  { %878 = vmatmul.mubr.msk.f32.vlgmr.msra.gmra.mxu1 %vm1067_vm3, %v387_v47 }
 0x11d   :  { %v397_v49 = vrot.slane %v381_v45, 7  ;;  %v385_v50 = vrot.slane %v381_v45, 1 }
 0x11f   :  { %v401_v51 = vsel %vm144_vm0, %v397_v49, %v394_v48  ;;  %v386_v53 = vsel %vm131_vm1, %v384_v44, %v385_v50  ;;  %v389_v54 = vsel %vm131_vm1, %v385_v50, %v382_v33  ;;  %v398_v0 = vsel %vm144_vm0, %v396_v7, %v397_v49 }
 0x120   :  { %668 = vmatmul.mubr.msk.f32.vlgmr.msra.gmra.mxu0 %vm1055_vm2, %v401_v51  ;;  %880 = vmatprep.mubr.f32.mxu1 %v386_v53 }
 0x121   :  { %530 = vmatprep.mubr.f32.mxu0 %v379_v30  ;;  %881 = vmatmul.mubr.msk.f32.gmra.mxu1 %vm1081_vm4, %v389_v54 }
 0x124   :  { %531 = vmatmul.mubr.f32.gmra.mxu0 %v400_v56 }
 0x125   :  { %535 = vmatprep.mubr.f32.mxu0 %v380_v38 }
 0x128   :  { %670 = vmatmul.mubr.msk.f32.gmra.mxu0 %vm1088_vm5, %v399_v57 }
 0x129   :  { %540 = vmatprep.mubr.f32.mxu0 %v381_v45 }
 0x12c   :  { %541 = vmatmul.mubr.f32.gmra.mxu0 %v398_v0 }
 0x1dc   :  { %v879_v17 = vpop.f32.mrf.mxu1 }
 0x1de   :  { %v612_v1 = vpop.f32.mrf.mxu1 }
 0x1e0   :  { %v775_v58 = vpop.f32.mrf.mxu0 }
 0x1e1   :  { %v882_v6 = vpop.f32.mrf.mxu1 }
 0x1e2   :  { %v776_v60 = vpop.f32.mrf.mxu0 }
 0x1e3   :  { %v777_v61 = vadd.f32 %v776_v60, %v775_v58  ;;  %v622_v14 = vpop.f32.mrf.mxu1 }
 0x1e4   :  { %v778_v62 = vpop.f32.mrf.mxu0 }
 0x1e5   :  { %v528_v63 = vadd.f32 %v777_v61, %v666_v59 }
 0x1e6   :  { %v779_v2 = vpop.f32.mrf.mxu0 }
 0x1e7   :  { %v613_v3 = vadd.f32 %v612_v1, %v528_v63  ;;  %v780_v20 = vadd.f32 %v779_v2, %v778_v62 }
 0x1e8   :  { %v781_v4 = vpop.f32.mrf.mxu0 }
 0x1e9   :  { %v631_v5 = vadd.f32 %v613_v3, %v1031_v41  ;;  %v533_v39 = vadd.f32 %v780_v20, %v666_v59 }
 0x1ea   :  { %v782_v8 = vpop.f32.mrf.mxu0 }
 0x1eb   :  { %635 = vst [vmem:[#allocation8] sm:$0xff] %v631_v5  ;;  %v618_v9 = vadd.f32 %v879_v17, %v533_v39  ;;  %v783_v10 = vadd.f32 %v782_v8, %v781_v4 }
 0x1ec   :  { %v784_v11 = vpop.f32.mrf.mxu0 }
 0x1ed   :  { %v632_v12 = vadd.f32 %v618_v9, %v1035_v46  ;;  %v538_v13 = vadd.f32 %v783_v10, %v666_v59 }
 0x1ee   :  { %v785_v15 = vpop.f32.mrf.mxu0 }
 0x1ef   :  { %636 = vst [vmem:[#allocation8 + $0x8] sm:$0xff] %v632_v12  ;;  %v623_v16 = vadd.f32 %v622_v14, %v538_v13  ;;  %v786_v18 = vadd.f32 %v785_v15, %v784_v11 }
 0x1f1   :  { %v633_v19 = vadd.f32 %v623_v16, %v1041_v52  ;;  %v543_v21 = vadd.f32 %v786_v18, %v666_v59 }
 0x1f3   :  { %637 = vst [vmem:[#allocation8 + $0x10] sm:$0xff] %v633_v19  ;;  %v628_v41 = vadd.f32 %v882_v6, %v543_v21 }
 0x1f5   :  { %v634_v22 = vadd.f32 %v628_v41, %v1033_v42 }
 0x1f7   :  { %638 = vst [vmem:[#allocation8 + $0x18] sm:$0xff] %v634_v22 }
 0x1f8   :  { %960 = shalt.err (!%p957_p5)
}
 0x1f9   :  { %650 = dma.vmem_to_hbm [thread:$0]  %s645_s10, 512, %s1146_s5, [#allocation4], %s977_s23, %s977_s23, %s978_s24  }
 0x1fa   :  { %973 = dma.done.wait [#allocation4], 512  }
 0x1fb   :  { %974 = vsyncadd [#allocation4], 4294966784 }
 0x1fc   :  { %654 = vsyncpa [#allocation3], 1 }
 0x1fd   :  { %655 = vsyncpa [#allocation6], 1 }
 0x1fe   :  { %656 = vsyncpa [#allocation4], 1 }

</bundles_post_ra>
